<compile_context>
chip_gen: v7x
topology: tpu7x:2x2x1
jax: 0.10.0
libtpu: 0.0.40
codegen_flags: <defaults>
</compile_context>

<pallas_src>
import jax
import jax.numpy as jnp
from jax import lax
from jax.experimental import pallas as pl
from jax.experimental.pallas import tpu as pltpu


def _round_up(x, m):
    return (x + m - 1) // m * m


def _sublane(itemsize):
    # Native sublane packing per element width (f32 -> 8, bf16 -> 16, int8 -> 32).
    return {4: 8, 2: 16, 1: 32}.get(itemsize, 8)


def _linear_kernel(x_ref, w_ref, b_ref, o_ref):
    # x_ref: (TM, F), w_ref: (L, F), b_ref: (1, L), o_ref: (TM, L)
    # Contract over F on the MXU, accumulate in f32, add bias, store only the
    # L real lanes (no 128-lane-padded HBM output).
    acc = lax.dot_general(
        x_ref[...], w_ref[...],
        dimension_numbers=(((1,), (1,)), ((), ())),
        preferred_element_type=jnp.float32,
    )
    o_ref[...] = (acc + b_ref[...].astype(jnp.float32)).astype(o_ref.dtype)


def text_decoder_forward(x, weight, bias, *, tm=2048, allow_xla_fast_path=True):
    """x: [..., F]; weight: [L, F]; bias: [L] -> [..., L]  (== nn.Linear)."""
    *lead, F = x.shape
    L = weight.shape[0]
    M = 1
    for d in lead:
        M *= d

    itemsize = jnp.dtype(x.dtype).itemsize
    w_itemsize = jnp.dtype(weight.dtype).itemsize

    # ---- tiny-M fast path: a single-step Pallas launch is pure overhead ----
    if allow_xla_fast_path and M * F * itemsize < (1 << 20):
        return (x @ weight.T + bias).astype(x.dtype)

    x2d = x.reshape(M, F)
    b2d = bias.reshape(1, L)

    sub = _sublane(itemsize)

    # ---- per-generation VMEM budget ----------------------------------------
    try:
        vmem_cap = int(pltpu.get_tpu_info().vmem_capacity_bytes)
    except Exception:
        vmem_cap = 64 << 20                      # conservative fallback (v7x-sized)
    vmem_budget = min(vmem_cap * 3 // 4, 100 << 20)

    # ---- derive the row tile TM from the budget ----------------------------
    lane_F = _round_up(F, 128)                   # physical lane footprint in VMEM
    lane_L = _round_up(L, 128)
    resident = (2 * _round_up(L, 8) * lane_F * w_itemsize   # weight (double-buffered)
                + 2 * lane_L * w_itemsize)                  # bias
    slack = 8 << 20                              # compiler-internal scratch headroom
    per_row = 2 * lane_F * itemsize + 2 * lane_L * itemsize  # x + out, double-buffered
    avail = max(vmem_budget - resident - slack, per_row * sub)
    tm_budget = max((avail // per_row) // sub * sub, sub)

    TM = min(_round_up(tm, sub), tm_budget)
    if M >= 2 * sub:                             # keep >=2 parallel tiles (v7x megacore)
        TM = min(TM, _round_up(pl.cdiv(M, 2), sub))
    TM = max(min(TM, _round_up(M, sub)), sub)

    grid = (pl.cdiv(M, TM),)

    vmem_need = 2 * TM * lane_F * itemsize + 2 * TM * lane_L * itemsize + resident
    vmem_limit = int(max(min(vmem_budget, vmem_need + (8 << 20)), 16 << 20))

    # Scheduling hint with the *true* (unpadded) problem size.
    cost = pl.CostEstimate(
        flops=2 * M * F * L,
        transcendentals=0,
        bytes_accessed=itemsize * (M * F + M * L) + w_itemsize * (L * F + L),
    )

    out = pl.pallas_call(
        _linear_kernel,
        out_shape=jax.ShapeDtypeStruct((M, L), x.dtype),
        grid_spec=pltpu.PrefetchScalarGridSpec(
            num_scalar_prefetch=0,
            grid=grid,
            in_specs=[
                pl.BlockSpec((TM, F), lambda i: (i, 0)),   # x: streamed row tiles
                pl.BlockSpec((L, F), lambda i: (0, 0)),    # weight: resident, native layout
                pl.BlockSpec((1, L), lambda i: (0, 0)),    # bias: resident
            ],
            out_specs=pl.BlockSpec((TM, L), lambda i: (i, 0)),
        ),
        compiler_params=pltpu.CompilerParams(
            dimension_semantics=("parallel",),   # independent rows -> megacore sharding
            vmem_limit_bytes=vmem_limit,
        ),
        cost_estimate=cost,
    )(x2d, weight, b2d)

    return out.reshape(*lead, L)


def init_params(key, feature_size, label_num, dtype=jnp.float32):
    # Deterministic synthetic init (mimics nn.Linear's uniform(-1/sqrt(F), 1/sqrt(F))).
    kw, kb = jax.random.split(key)
    bound = 1.0 / (feature_size ** 0.5)
    weight = jax.random.uniform(kw, (label_num, feature_size), dtype,
                                minval=-bound, maxval=bound)
    bias = jax.random.uniform(kb, (label_num,), dtype,
                              minval=-bound, maxval=bound)
    return weight, bias


if __name__ == "__main__":
    key = jax.random.PRNGKey(0)
    kx1, kx2, kp = jax.random.split(key, 3)

    feature_size, label_num = 768, 3
    weight, bias = init_params(kp, feature_size, label_num)

    # 1) Small nominal shape: force the Pallas path so the kernel itself runs.
    batch, seq = 2, 8
    x1 = jax.random.normal(kx1, (batch, seq, feature_size), jnp.float32)
    y1 = jax.block_until_ready(
        text_decoder_forward(x1, weight, bias, allow_xla_fast_path=False))
    ref1 = x1 @ weight.T + bias
    assert y1.shape == (batch, seq, label_num)
    assert jnp.allclose(y1, ref1, atol=2e-5, rtol=2e-5)

    # 2) Larger, ragged M: exercises the multi-step tiled path + masked tail
    #    (M = 2100 is not a multiple of the chosen row tile).
    x2 = jax.random.normal(kx2, (3, 700, feature_size), jnp.float32)
    y2 = jax.block_until_ready(text_decoder_forward(x2, weight, bias))
    ref2 = x2 @ weight.T + bias
    assert y2.shape == (3, 700, label_num)
    assert jnp.allclose(y2, ref2, atol=2e-5, rtol=2e-5)

    print("KERNEL_OK")
</pallas_src>

<mosaic_0001>
module attributes {stable_mosaic.version = 11 : i64} {
  func.func @_linear_kernel(%arg0: i32, %arg1: memref<8x768xf32, #tpu.memory_space<vmem>>, %arg2: memref<3x768xf32, #tpu.memory_space<vmem>>, %arg3: memref<1x3xf32, #tpu.memory_space<vmem>>, %arg4: memref<8x3xf32, #tpu.memory_space<vmem>>) attributes {dimension_semantics = [#tpu.dimension_semantics<parallel>], iteration_bounds = array<i64: 2>, scalar_prefetch = 0 : i64, scratch_operands = 0 : i64, tpu.core_type = #tpu.core_type<tc>, window_params = [{transform_indices = @transform_0, window_bounds = array<i64: 8, 768>}, {pipeline_mode = #tpu.pipeline_mode<synchronous>, transform_indices = @transform_1, window_bounds = array<i64: 3, 768>}, {pipeline_mode = #tpu.pipeline_mode<synchronous>, transform_indices = @transform_2, window_bounds = array<i64: 1, 3>}, {transform_indices = @transform_3, window_bounds = array<i64: 8, 3>}]} {
    %c0 = arith.constant 0 : index
    %c0_0 = arith.constant 0 : index
    %0 = vector.load %arg1[%c0, %c0_0] : memref<8x768xf32, #tpu.memory_space<vmem>>, vector<8x768xf32>
    %c0_1 = arith.constant 0 : index
    %c0_2 = arith.constant 0 : index
    %1 = vector.load %arg2[%c0_1, %c0_2] : memref<3x768xf32, #tpu.memory_space<vmem>>, vector<3x768xf32>
    %cst = arith.constant dense<0.000000e+00> : vector<8x3xf32>
    %2 = tpu.matmul %0, %1, %cst {dimension_numbers = #tpu.dot_dimension_numbers<[1], [1], [0], [0], [0, 0, 1, 0], [], []>} : vector<8x768xf32>, vector<3x768xf32>, vector<8x3xf32> -> vector<8x3xf32>
    %c0_3 = arith.constant 0 : index
    %c0_4 = arith.constant 0 : index
    %3 = vector.load %arg3[%c0_3, %c0_4] : memref<1x3xf32, #tpu.memory_space<vmem>>, vector<1x3xf32>
    %4 = vector.broadcast %3 : vector<1x3xf32> to vector<8x3xf32>
    %5 = arith.addf %2, %4 : vector<8x3xf32>
    %c0_5 = arith.constant 0 : index
    %c0_6 = arith.constant 0 : index
    %6 = vector.load %arg4[%c0_5, %c0_6] : memref<8x3xf32, #tpu.memory_space<vmem>>, vector<8x3xf32>
    tpu.vector_store %arg4[%c0_5, %c0_6], %5 {strides = array<i32>} : memref<8x3xf32, #tpu.memory_space<vmem>>, vector<8x3xf32>,
    return
  }
  func.func @transform_0(%arg0: i32) -> (i32, i32) {
    %c0_i32 = arith.constant 0 : i32
    %c0_i32_0 = arith.constant 0 : i32
    return %arg0, %c0_i32 : i32, i32
  }
  func.func @transform_1(%arg0: i32) -> (i32, i32) {
    %c0_i32 = arith.constant 0 : i32
    %c0_i32_0 = arith.constant 0 : i32
    %c0_i32_1 = arith.constant 0 : i32
    return %c0_i32, %c0_i32_0 : i32, i32
  }
  func.func @transform_2(%arg0: i32) -> (i32, i32) {
    %c0_i32 = arith.constant 0 : i32
    %c0_i32_0 = arith.constant 0 : i32
    %c0_i32_1 = arith.constant 0 : i32
    return %c0_i32, %c0_i32_0 : i32, i32
  }
  func.func @transform_3(%arg0: i32) -> (i32, i32) {
    %c0_i32 = arith.constant 0 : i32
    %c0_i32_0 = arith.constant 0 : i32
    return %arg0, %c0_i32 : i32, i32
  }
}

</mosaic_0001>

<bundles_post_ra>
// kernel: tpu_custom_call.1
= control target key start
LH: loop header
LB: loop body
LE: loop exit
PB: predicated region body
PF: predicated region fallthrough
CT: control target
= control target key end

     0   :  { %8 = vsyncpa [#allocation3], 0  ;;  %s854_s0 = inlined_call_operand.hbm [shape: f32[16,768], index: 0, kind: input, shape index: {}]   ;;  %s855_s1 = inlined_call_operand.hbm [shape: f32[3,768], index: 1, kind: input, shape index: {}]   ;;  %s856_s2 = inlined_call_operand.vmem [shape: f32[1,3], index: 2, kind: input, shape index: {}]   ;;  %s857_s3 = inlined_call_operand.vmem [shape: f32[16,3], index: 3, kind: output, shape index: {}]  }
   0x1   :  { %10 = vsyncpa [#allocation3 + $0x1], 0 }
   0x2   :  { %11 = vsyncpa [#allocation5], 0  ;;  %s703_s12 = smov 0   ;;  %s705_s13 = smov 0  }
   0x3   :  { %s707_s14 = smov 0   ;;  %s709_s15 = smov 0  }
   0x4 LB: > { %s722_s16 = sadd.s32 4294967295, %s679_s15   ;;  %p37_p0 = scmp.ne.s32.totalorder %s671_s13, %s667_s12  ;;  %s679_s15 = sphi %s709_s15, %s875_s15   ;;  %s675_s14 = sphi %s707_s14, %s874_s14   ;;  %s671_s13 = sphi %s705_s13, %s873_s13   ;;  %s667_s12 = sphi %s703_s12, %s872_s12  }
   0x5   : > { %p858_p1 = scmp.eq.s32.totalorder %s722_s16, 0  ;;  %p513_p2 = scmp.ge.s32.totalorder %s679_s15, 1 }
   0x6   : > { %p116_p3 = scmp.lt.s32.totalorder %s679_s15, 3  ;;  %s681_s19 = smov [#allocation4]  }
   0x7   : > { %p730_p4 = por %p858_p1, %p37_p0  ;;  %s129_s20 = sshll.u32 %s681_s19, 4  ;;  %s130_s20 = int_to_ptr.vmem [resolvable:$true] %s129_s20 }
   0x8   : > { %p734_p5 = pnand %p513_p2, %p116_p3  ;;  %s741_s21 = sadd.s32 1, %s679_s15  }
   0x9   : > { %s861_s17 = scalar_select %p730_p4, 1, 0 }
   0xa   : > { %s862_s18 = scalar_select %p734_p5, 1, 0 }
   0xb   : > { %p536_p6 = pneg %p734_p5  ;;  %s21_s23 = ssub.s32 %s679_s15, %s741_s21 }
   0xc   : > { %p751_p8 = scmp.eq.s32.totalorder %s21_s23, 0  ;;  %s24_s25 = sadd.s32 1, %s675_s14 }
   0xd   : > { %p745_p7 = pnand %p536_p6, %p858_p1  ;;  %s583_s28 = scalar_lea.hbm %s855_s1, 384 }
   0xe   : > { %s864_s24 = scalar_select %p751_p8, 1, 0 }
   0xf   : > { %p584_p10 = scmp.ne.s32.totalorder %s855_s1, %s583_s28  ;;  %p585_p11 = pneg %p745_p7 }
  0x10   : > { %p590_p0 = scmp.lt.u32.totalorder %s583_s28, %s855_s1 }
  0x11   : > { %p586_p12 = pnand %p585_p11, %p584_p10 }
  0x13   : > { %p587_p13 = pneg %p586_p12 }
  0x15   : > { %p592_p2 = pnand %p590_p0, %p587_p13 }
  0x17   : > { %595 = shalt.err (!%p592_p2)
}
  0x18   : > { %s596_s6 = scalar_lea.vmem %s130_s20, 384  ;;  %p604_p9 = scmp.lt.s32.totalorder %s130_s20, %s130_s20 }
  0x19   : > { %p597_p3 = scmp.ne.s32.totalorder %s130_s20, %s596_s6  ;;  %p605_p4 = scmp.lt.s32.totalorder %s596_s6, %s596_s6 }
  0x1b   : > { %p599_p6 = pnand %p597_p3, %p585_p11  ;;  %p606_p5 = por %p605_p4, %p604_p9 }
  0x1d   : > { %p600_p1 = pneg %p599_p6 }
  0x1f   : > { %p607_p8 = pnand %p606_p5, %p600_p1 }
  0x21   : > { %610 = shalt.err (!%p607_p8)
}
  0x22   : > { %539 = dma.hbm_to_vmem [thread:$0]  (!%p745_p7), %s855_s1, 384, %s130_s20, [#allocation5]  }
  0x23   : > { %p865_p10 = scmp.ne.s32.totalorder %s864_s24, 0  ;;  %p32_p4 = scmp.eq.s32.totalorder %s679_s15, 0 }
  0x24   : > { %p545_p1 = scmp.lt.s32.totalorder %s679_s15, 2  ;;  %s143_s10 = sand.u32 1, %s675_s14  }
  0x25   : > { %s777_s9 = scalar_select %p865_p10, %s675_s14, %s24_s25  }
  0x26   : > { %s528_s11 = smul.u32 768, %s679_s15  ;;  %p866_p5 = scmp.ne.s32.totalorder %s675_s14, %s671_s13 }
  0x27   : > { %s527_s12 = smul.u32 48, %s143_s10  ;;  %s144_s25 = scalar_lea.sflag [#allocation3], %s143_s10 }
  0x28   : > { %p33_p8 = por %p32_p4, %p866_p5  ;;  %s793_s20 = scalar_lea.hbm %s854_s0, %s528_s11 }
  0x29   : > { %s147_s24 = scalar_lea.vmem [#allocation2], %s527_s12  ;;  %s611_s26 = scalar_lea.hbm %s793_s20, 768 }
  0x2a   : > { %p786_p9 = pnand %p545_p1, %p33_p8  ;;  %s155_s15 = sshll.u32 %s147_s24, 4  ;;  %s795_s15 = int_to_ptr.vmem [resolvable:$true] %s155_s15 }
  0x2b   : > { %p612_p7 = scmp.ne.s32.totalorder %s793_s20, %s611_s26  ;;  %s616_s29 = scalar_lea.hbm %s854_s0, 1536 }
  0x2c   : > { %p613_p11 = pneg %p786_p9  ;;  %p617_p0 = scmp.lt.u32.totalorder %s793_s20, %s854_s0 }
  0x2d   : > { %p618_p2 = scmp.lt.u32.totalorder %s616_s29, %s611_s26  ;;  %p620_p6 = scmp.lt.u32.totalorder %s611_s26, %s793_s20 }
  0x2e   : > { %p614_p12 = pnand %p613_p11, %p612_p7 }
  0x2f   : > { %p619_p3 = por %p618_p2, %p617_p0 }
  0x30   : > { %p615_p13 = pneg %p614_p12 }
  0x31   : > { %p621_p10 = por %p620_p6, %p619_p3 }
  0x33   : > { %p622_p4 = pnand %p621_p10, %p615_p13 }
  0x35   : > { %625 = shalt.err (!%p622_p4)
}
  0x36   : > { %s626_s5 = scalar_lea.vmem %s795_s15, 768  ;;  %s682_s6 = smov [#allocation2]  }
  0x37   : > { %p627_p1 = scmp.ne.s32.totalorder %s795_s15, %s626_s5  ;;  %s631_s7 = sshll.u32 %s682_s6, 4  ;;  %s632_s7 = int_to_ptr.vmem [resolvable:$false] %s631_s7 }
  0x38   : > { %s633_s8 = scalar_lea.vmem %s632_s7, 1536  ;;  %p634_p7 = scmp.lt.s32.totalorder %s795_s15, %s632_s7 }
  0x39   : > { %p629_p5 = pnand %p627_p1, %p613_p11  ;;  %p635_p12 = scmp.lt.s32.totalorder %s633_s8, %s626_s5 }
  0x3b   : > { %p630_p8 = pneg %p629_p5  ;;  %p636_p0 = por %p635_p12, %p634_p7 }
  0x3d   : > { %p637_p2 = pnand %p636_p0, %p630_p8 }
  0x3f   : > { %640 = shalt.err (!%p637_p2)
}
  0x40   : > { %543 = dma.hbm_to_vmem [thread:$0]  (!%p786_p9), %s793_s20, 768, %s795_s15, %s144_s25  }
  0x41   : > { %p868_p13 = scmp.ne.s32.totalorder %s862_s18, 0 }
  0x42   : > { %s166_s10 = sand.u32 (!%p868_p13), 1, %s671_s13   ;;  %p869_p11 = scmp.ne.s32.totalorder (!%p868_p13), %s861_s17, 0 }
  0x43   : > { %164 = sbr.rel (%p868_p13) target bundleno = 308 (0x134), region = 32  ;;  %s167_s12 = scalar_lea.sflag (!%p868_p13), [#allocation3], %s166_s10 }
  0x44   : > { %s529_s11 = smul.u32 (!%p868_p13), 48, %s166_s10 }
  0x46   : > { %s170_s22 = scalar_lea.vmem (!%p868_p13), [#allocation2], %s529_s11 }
  0x4a   : > { %658 = dma.done.wait (%p869_p11), %s167_s12, 768  }
  0x4b   : > { %660 = vsyncadd (%p869_p11), %s167_s12, 4294966528  ;;  %p870_p3 = scmp.eq.s32.totalorder %s722_s16, 0 }
  0x4d   : > { %662 = dma.done.wait (%p870_p3), [#allocation5], 384   ;;  %p871_p6 = pmov %p870_p3 }
  0x4e   : > { %v207_v0 = vld [vmem:[#allocation4 + $0x8] sm:$0x77]  ;;  %v208_v3 = vld [vmem:[#allocation4 + $0x10] sm:$0x77]  ;;  %v206_v4 = vld [vmem:[#allocation4] sm:$0x77] }
  0x4f   : > { %664 = vsyncadd (%p871_p6), [#allocation5], 4294966912  ;;  %v203_v1 = vld [vmem:[%s170_s22 + $0x18] sm:$0xff]  ;;  %v220_v2 = vcombine.high %v207_v0, %v207_v0  ;;  %v201_v5 = vld [vmem:[%s170_s22 + $0x8] sm:$0xff]  ;;  %v221_v6 = vcombine.high %v208_v3, %v208_v3  ;;  %v219_v7 = vcombine.high %v206_v4, %v206_v4  ;;  %p196_p9 = scmp.lt.s32.totalorder %s722_s16, 1  ;;  %vm435_vm0 = vcmask 23552  }
  0x50   : > { %359 = vmatprep.mubr.f32.mxu0 %v203_v1  ;;  %289 = vmatprep.mubr.f32.mxu1 %v201_v5  ;;  %v202_v8 = vld [vmem:[%s170_s22 + $0x10] sm:$0xff]  ;;  %v200_v9 = vld [vmem:[%s170_s22] sm:$0xff]  ;;  %v205_v10 = vld [vmem:[%s170_s22 + $0x28] sm:$0xff] }
  0x51   : > { %295 = vmatprep.subr.mxu0 %v220_v2  ;;  %225 = vmatprep.subr.mxu1 %v219_v7  ;;  %v204_v11 = vld [vmem:[%s170_s22 + $0x20] sm:$0xff]  ;;  %s877_s16 = smov (!%p196_p9, %s722_s16), 1 }
  0x52   : > { %296 = vmatpush1.xpose.msra.mxu0 %v207_v0  ;;  %226 = vmatpush1.xpose.msra.mxu1 %v206_v4  ;;  %v520_v13 = vld [vmem:[%s856_s2] ss:$0 sm:$0xff]  ;;  %s519_s19 = sshll.u32 %s877_s16, 3 }
  0x53   : > { %365 = vmatprep.subr.mxu0 %v221_v6  ;;  %s199_s24 = scalar_lea.vmem %s857_s3, %s519_s19 }
  0x55   : > { %360 = vmatmul.mubr.f32.vlgmr.msra.gmra.mrb[0].mxu0 %v202_v8  ;;  %290 = vmatmul.mubr.f32.vlgmr.msra.gmra.mrb[0].mxu1 %v200_v9 }
  0x56   : > { %366 = vmatpush1.xpose.msra.mxu0 %v208_v3  ;;  %429 = vmatprep.mubr.f32.mxu0 %v205_v10 }
  0x5d   : > { %430 = vmatmul.mubr.f32.vlgmr.msra.gmra.mrb[0].mxu0 %v204_v11 }
 0x128   : > { %v291_v12 = vpop.f32.mrb[0].mxu1 }
 0x129   : > { %v293_v14 = vpop.f32.mrb[1].mxu1  ;;  %v292_v15 = vadd.f32 %v520_v13, %v291_v12 }
 0x130   : > { %v431_v16 = vpop.f32.mrb[0].mxu0 }
 0x131   : > { %v524_v17 = vadd.f32 %v431_v16, %v292_v15  ;;  %v433_v18 = vpop.f32.mrb[1].mxu0 }
 0x133   : > { %436 = vst.msk [vmem:[%s199_s24] sm:$0xff] %vm435_vm0, %v524_v17 }
 0x134 PF: > { %p14_p10 = scmp.ge.s32.totalorder %s741_s21, 4   ;;  %s872_s12 = smov %s671_s13 }
 0x135   : > { %s873_s13 = smov %s675_s14  ;;  %s874_s14 = smov %s777_s9 }
 0x136   : > { %s875_s15 = smov %s741_s21  ;;  %16 = sbr.rel (!%p14_p10) target bundleno = 4 (0x4), region = 76 }
 0x13d   :  { %456 = vsyncpa [#allocation3], 1 }
 0x13e   :  { %458 = vsyncpa [#allocation3 + $0x1], 1 }
 0x13f   :  { %459 = vsyncpa [#allocation5], 1 }

</bundles_post_ra>
